<compile_context>
chip_gen: v5e
topology: v5e:2x2
jax: 0.10.0
libtpu: 0.0.40
codegen_flags: <defaults>
</compile_context>

<pallas_src>
import jax
import jax.numpy as jnp
from jax.experimental import pallas as pl
from jax.experimental.pallas import tpu as pltpu


def _round_up(x, m):
    return ((x + m - 1) // m) * m


def _transformation_loss_kernel(est_ref, gt_ref, r_out_ref, t_out_ref,
                                r_acc, t_acc):
    """est_ref/gt_ref: (16, BLOCK_B) f32 tiles of the transposed transforms.

    r_out_ref/t_out_ref: (8, 128) per-split partial sums (broadcast scalar).
    r_acc: (3, BLOCK_B) VMEM scratch, per-lane rotation squared residuals.
    t_acc: (1, BLOCK_B) VMEM scratch, per-lane translation squared residuals.
    """
    step = pl.program_id(1)
    num_steps = pl.num_programs(1)

    @pl.when(step == 0)
    def _init():
        r_acc[...] = jnp.zeros_like(r_acc)
        t_acc[...] = jnp.zeros_like(t_acc)

    # ---- rotation residuals:  M = R_est^T @ R_gt,  d = M - I ----------------
    # Row 4*k + i of the slab holds transform element (k, i), i.e. R[k, i].
    # e[k] is the (3, BLOCK_B) slab of rows [R_e[k,0], R_e[k,1], R_e[k,2]].
    e = [est_ref[4 * k:4 * k + 3, :] for k in range(3)]
    row_ids = jax.lax.broadcasted_iota(jnp.int32, (3, 1), 0)

    r_sq = None
    for j in range(3):
        # Column j of M for all rows i:  M[i, j] = sum_k R_e[k, i] * R_g[k, j].
        m_j = (e[0] * gt_ref[0 + j:0 + j + 1, :]
               + e[1] * gt_ref[4 + j:4 + j + 1, :]
               + e[2] * gt_ref[8 + j:8 + j + 1, :])           # (3, BLOCK_B)
        d_j = m_j - (row_ids == j).astype(jnp.float32)        # subtract I column
        sq = d_j * d_j
        r_sq = sq if r_sq is None else r_sq + sq
    r_acc[...] = r_acc[...] + r_sq

    # ---- translation residuals: rows 3, 7, 11 hold t[0..2] -------------------
    d0 = est_ref[3:4, :] - gt_ref[3:4, :]
    d1 = est_ref[7:8, :] - gt_ref[7:8, :]
    d2 = est_ref[11:12, :] - gt_ref[11:12, :]
    t_acc[...] = t_acc[...] + (d0 * d0 + d1 * d1 + d2 * d2)

    # ---- finalize: one cross-lane reduction per loss -------------------------
    @pl.when(step == num_steps - 1)
    def _finalize():
        r_sum = jnp.sum(r_acc[...], keepdims=True)            # (1, 1)
        t_sum = jnp.sum(t_acc[...], keepdims=True)            # (1, 1)
        r_out_ref[...] = jnp.broadcast_to(r_sum, r_out_ref.shape)
        t_out_ref[...] = jnp.broadcast_to(t_sum, t_out_ref.shape)


def _transformation_loss_jax(est, gt, w_r=1.0, w_t=1.0):
    """Fused pure-JAX path (reference + tiny-batch fallback)."""
    est = est.astype(jnp.float32)
    gt = gt.astype(jnp.float32)
    r_e, t_e = est[:, :3, :3], est[:, :3, 3]
    r_g, t_g = gt[:, :3, :3], gt[:, :3, 3]
    m = jnp.einsum('bki,bkj->bij', r_e, r_g)
    r_loss = jnp.mean((m - jnp.eye(3, dtype=jnp.float32)[None]) ** 2)
    t_loss = jnp.mean((t_e - t_g) ** 2)
    return w_r * r_loss + w_t * t_loss, r_loss, t_loss


def transformation_loss(estimated_transforms, gt_transforms,
                        weight_r_loss=1.0, weight_t_loss=1.0,
                        *, block_b=None, small_batch_threshold=0):
    """Pallas equivalent of TransformationLoss.forward.

    Args:
        estimated_transforms: (B, 4, 4)
        gt_transforms: (B, 4, 4)
        weight_r_loss / weight_t_loss: loss weights (applied in the wrapper).
        block_b: batch (lane) tile per grid step, multiple of 128.
        small_batch_threshold: below this batch size dispatch to the fused
            pure-JAX path (Pallas only pays off once HBM streaming dominates).

    Returns:
        (loss, r_loss, t_loss) f32 scalars.
    """
    B = estimated_transforms.shape[0]
    if B < small_batch_threshold:
        return _transformation_loss_jax(estimated_transforms, gt_transforms,
                                        weight_r_loss, weight_t_loss)

    # Note: computation is done in f32 (minor difference vs. PyTorch if inputs
    # are lower precision).
    if block_b is None:
        block_b = min(4096, _round_up(max(B, 1), 128))
    assert block_b % 128 == 0

    num_tiles = pl.cdiv(B, block_b)
    # Split the batch range across the two v7x TensorCores when there is more
    # than one tile of work (harmless sequential loop on single-core chips).
    num_splits = 2 if num_tiles >= 2 else 1
    tiles_per_split = pl.cdiv(num_tiles, num_splits)
    b_pad = num_splits * tiles_per_split * block_b

    est_flat = estimated_transforms.astype(jnp.float32).reshape(B, 16)
    gt_flat = gt_transforms.astype(jnp.float32).reshape(B, 16)
    if b_pad > B:
        # Pad with identity transforms: zero residual for both losses, so the
        # accumulated sums stay exact and the means divide by the true B.
        eye = jnp.broadcast_to(jnp.eye(4, dtype=jnp.float32).reshape(1, 16),
                               (b_pad - B, 16))
        est_flat = jnp.concatenate([est_flat, eye], axis=0)
        gt_flat = jnp.concatenate([gt_flat, eye], axis=0)

    est_t = est_flat.T                  # (16, b_pad): entries on sublanes,
    gt_t = gt_flat.T                    # batch on lanes (lane-dense).

    in_spec = pl.BlockSpec((16, block_b),
                           lambda c, i: (0, c * tiles_per_split + i))
    out_spec = pl.BlockSpec((8, 128), lambda c, i: (c, 0))
    out_shape = jax.ShapeDtypeStruct((num_splits * 8, 128), jnp.float32)

    r_part, t_part = pl.pallas_call(
        _transformation_loss_kernel,
        out_shape=(out_shape, out_shape),
        grid=(num_splits, tiles_per_split),
        in_specs=[in_spec, in_spec],
        out_specs=(out_spec, out_spec),
        scratch_shapes=[pltpu.VMEM((3, block_b), jnp.float32),
                        pltpu.VMEM((1, block_b), jnp.float32)],
        compiler_params=pltpu.CompilerParams(
            dimension_semantics=("parallel", "arbitrary")),
    )(est_t, gt_t)

    # Tiny scalar epilogue: combine per-core partial sums, normalize, weight.
    r_sum = jnp.sum(r_part.reshape(num_splits, 8, 128)[:, 0, 0])
    t_sum = jnp.sum(t_part.reshape(num_splits, 8, 128)[:, 0, 0])
    r_loss = r_sum / jnp.float32(9 * B)      # F.mse_loss mean over B*3*3
    t_loss = t_sum / jnp.float32(3 * B)      # F.mse_loss mean over B*3
    loss = weight_r_loss * r_loss + weight_t_loss * t_loss
    return loss, r_loss, t_loss


if __name__ == "__main__":
    key = jax.random.PRNGKey(0)
    k1, k2, k3, k4 = jax.random.split(key, 4)

    # Small shapes consistent with the module: a batch of 4x4 transforms.
    B = 8
    est = jax.random.normal(k1, (B, 4, 4), dtype=jnp.float32)
    gt = jax.random.normal(k2, (B, 4, 4), dtype=jnp.float32)

    loss, r_loss, t_loss = transformation_loss(est, gt, 1.0, 1.0)
    jax.block_until_ready((loss, r_loss, t_loss))

    ref_loss, ref_r, ref_t = _transformation_loss_jax(est, gt, 1.0, 1.0)
    assert jnp.allclose(loss, ref_loss, rtol=1e-5, atol=1e-5)
    assert jnp.allclose(r_loss, ref_r, rtol=1e-5, atol=1e-5)
    assert jnp.allclose(t_loss, ref_t, rtol=1e-5, atol=1e-5)

    # Exercise the multi-tile grid + two-way split + identity-padding path.
    B2 = 300
    est2 = jax.random.normal(k3, (B2, 4, 4), dtype=jnp.float32)
    gt2 = jax.random.normal(k4, (B2, 4, 4), dtype=jnp.float32)
    loss2, r2, t2 = transformation_loss(est2, gt2, 0.5, 2.0, block_b=128)
    jax.block_until_ready((loss2, r2, t2))
    ref2 = _transformation_loss_jax(est2, gt2, 0.5, 2.0)
    assert jnp.allclose(loss2, ref2[0], rtol=1e-4, atol=1e-5)
    assert jnp.allclose(r2, ref2[1], rtol=1e-4, atol=1e-5)
    assert jnp.allclose(t2, ref2[2], rtol=1e-4, atol=1e-5)

    print("KERNEL_OK")
</pallas_src>

<mosaic_0001>
module attributes {stable_mosaic.version = 11 : i64} {
  func.func @_transformation_loss_kernel(%arg0: i32, %arg1: i32, %arg2: memref<16x128xf32, #tpu.memory_space<vmem>>, %arg3: memref<16x128xf32, #tpu.memory_space<vmem>>, %arg4: memref<8x128xf32, #tpu.memory_space<vmem>>, %arg5: memref<8x128xf32, #tpu.memory_space<vmem>>, %arg6: memref<3x128xf32, #tpu.memory_space<vmem>>, %arg7: memref<1x128xf32, #tpu.memory_space<vmem>>) attributes {dimension_semantics = [#tpu.dimension_semantics<parallel>, #tpu.dimension_semantics<arbitrary>], iteration_bounds = array<i64: 1, 1>, scalar_prefetch = 0 : i64, scratch_operands = 2 : i64, tpu.core_type = #tpu.core_type<tc>, window_params = [{transform_indices = @transform_0, window_bounds = array<i64: 16, 128>}, {transform_indices = @transform_1, window_bounds = array<i64: 16, 128>}, {transform_indices = @transform_2, window_bounds = array<i64: 8, 128>}, {transform_indices = @transform_3, window_bounds = array<i64: 8, 128>}]} {
    %c0_i32 = arith.constant 0 : i32
    %0 = arith.cmpi eq, %arg1, %c0_i32 : i32
    %1 = arith.extui %0 : i1 to i32
    %c0_i32_0 = arith.constant 0 : i32
    %2 = arith.cmpi ne, %1, %c0_i32_0 : i32
    scf.if %2 {
      %cst = arith.constant 0.000000e+00 : f32
      %86 = vector.broadcast %cst : f32 to vector<3x128xf32>
      %c0_36 = arith.constant 0 : index
      %c0_37 = arith.constant 0 : index
      %87 = vector.load %arg6[%c0_36, %c0_37] : memref<3x128xf32, #tpu.memory_space<vmem>>, vector<3x128xf32>
      tpu.vector_store %arg6[%c0_36, %c0_37], %86 {strides = array<i32>} : memref<3x128xf32, #tpu.memory_space<vmem>>, vector<3x128xf32>,
      %cst_38 = arith.constant 0.000000e+00 : f32
      %88 = vector.broadcast %cst_38 : f32 to vector<1x128xf32>
      %c0_39 = arith.constant 0 : index
      %c0_40 = arith.constant 0 : index
      %89 = vector.load %arg7[%c0_39, %c0_40] : memref<1x128xf32, #tpu.memory_space<vmem>>, vector<1x128xf32>
      tpu.vector_store %arg7[%c0_39, %c0_40], %88 {strides = array<i32>} : memref<1x128xf32, #tpu.memory_space<vmem>>, vector<1x128xf32>,
    } else {
    }
    %c0 = arith.constant 0 : index
    %c0_1 = arith.constant 0 : index
    %3 = vector.load %arg2[%c0, %c0_1] : memref<16x128xf32, #tpu.memory_space<vmem>>, vector<3x128xf32>
    %c4 = arith.constant 4 : index
    %c0_2 = arith.constant 0 : index
    %4 = vector.load %arg2[%c4, %c0_2] : memref<16x128xf32, #tpu.memory_space<vmem>>, vector<3x128xf32>
    %c8 = arith.constant 8 : index
    %c0_3 = arith.constant 0 : index
    %5 = vector.load %arg2[%c8, %c0_3] : memref<16x128xf32, #tpu.memory_space<vmem>>, vector<3x128xf32>
    %6 = tpu.iota {dimensions = array<i32: 0>} : vector<3x1xi32>
    %c0_4 = arith.constant 0 : index
    %c0_5 = arith.constant 0 : index
    %7 = vector.load %arg3[%c0_4, %c0_5] : memref<16x128xf32, #tpu.memory_space<vmem>>, vector<1x128xf32>
    %8 = vector.broadcast %7 : vector<1x128xf32> to vector<3x128xf32>
    %9 = arith.mulf %3, %8 : vector<3x128xf32>
    %c4_6 = arith.constant 4 : index
    %c0_7 = arith.constant 0 : index
    %10 = vector.load %arg3[%c4_6, %c0_7] : memref<16x128xf32, #tpu.memory_space<vmem>>, vector<1x128xf32>
    %11 = vector.broadcast %10 : vector<1x128xf32> to vector<3x128xf32>
    %12 = arith.mulf %4, %11 : vector<3x128xf32>
    %13 = arith.addf %9, %12 : vector<3x128xf32>
    %c8_8 = arith.constant 8 : index
    %c0_9 = arith.constant 0 : index
    %14 = vector.load %arg3[%c8_8, %c0_9] : memref<16x128xf32, #tpu.memory_space<vmem>>, vector<1x128xf32>
    %15 = vector.broadcast %14 : vector<1x128xf32> to vector<3x128xf32>
    %16 = arith.mulf %5, %15 : vector<3x128xf32>
    %17 = arith.addf %13, %16 : vector<3x128xf32>
    %c0_i32_10 = arith.constant 0 : i32
    %18 = vector.broadcast %c0_i32_10 : i32 to vector<3x1xi32>
    %19 = arith.cmpi eq, %6, %18 : vector<3x1xi32>
    %20 = arith.extui %19 : vector<3x1xi1> to vector<3x1xi32>
    %21 = arith.sitofp %20 : vector<3x1xi32> to vector<3x1xf32>
    %22 = vector.broadcast %21 : vector<3x1xf32> to vector<3x128xf32>
    %23 = arith.subf %17, %22 : vector<3x128xf32>
    %24 = arith.mulf %23, %23 : vector<3x128xf32>
    %c1 = arith.constant 1 : index
    %c0_11 = arith.constant 0 : index
    %25 = vector.load %arg3[%c1, %c0_11] : memref<16x128xf32, #tpu.memory_space<vmem>>, vector<1x128xf32>
    %26 = vector.broadcast %25 : vector<1x128xf32> to vector<3x128xf32>
    %27 = arith.mulf %3, %26 : vector<3x128xf32>
    %c5 = arith.constant 5 : index
    %c0_12 = arith.constant 0 : index
    %28 = vector.load %arg3[%c5, %c0_12] : memref<16x128xf32, #tpu.memory_space<vmem>>, vector<1x128xf32>
    %29 = vector.broadcast %28 : vector<1x128xf32> to vector<3x128xf32>
    %30 = arith.mulf %4, %29 : vector<3x128xf32>
    %31 = arith.addf %27, %30 : vector<3x128xf32>
    %c9 = arith.constant 9 : index
    %c0_13 = arith.constant 0 : index
    %32 = vector.load %arg3[%c9, %c0_13] : memref<16x128xf32, #tpu.memory_space<vmem>>, vector<1x128xf32>
    %33 = vector.broadcast %32 : vector<1x128xf32> to vector<3x128xf32>
    %34 = arith.mulf %5, %33 : vector<3x128xf32>
    %35 = arith.addf %31, %34 : vector<3x128xf32>
    %c1_i32 = arith.constant 1 : i32
    %36 = vector.broadcast %c1_i32 : i32 to vector<3x1xi32>
    %37 = arith.cmpi eq, %6, %36 : vector<3x1xi32>
    %38 = arith.extui %37 : vector<3x1xi1> to vector<3x1xi32>
    %39 = arith.sitofp %38 : vector<3x1xi32> to vector<3x1xf32>
    %40 = vector.broadcast %39 : vector<3x1xf32> to vector<3x128xf32>
    %41 = arith.subf %35, %40 : vector<3x128xf32>
    %42 = arith.mulf %41, %41 : vector<3x128xf32>
    %43 = arith.addf %24, %42 : vector<3x128xf32>
    %c2 = arith.constant 2 : index
    %c0_14 = arith.constant 0 : index
    %44 = vector.load %arg3[%c2, %c0_14] : memref<16x128xf32, #tpu.memory_space<vmem>>, vector<1x128xf32>
    %45 = vector.broadcast %44 : vector<1x128xf32> to vector<3x128xf32>
    %46 = arith.mulf %3, %45 : vector<3x128xf32>
    %c6 = arith.constant 6 : index
    %c0_15 = arith.constant 0 : index
    %47 = vector.load %arg3[%c6, %c0_15] : memref<16x128xf32, #tpu.memory_space<vmem>>, vector<1x128xf32>
    %48 = vector.broadcast %47 : vector<1x128xf32> to vector<3x128xf32>
    %49 = arith.mulf %4, %48 : vector<3x128xf32>
    %50 = arith.addf %46, %49 : vector<3x128xf32>
    %c10 = arith.constant 10 : index
    %c0_16 = arith.constant 0 : index
    %51 = vector.load %arg3[%c10, %c0_16] : memref<16x128xf32, #tpu.memory_space<vmem>>, vector<1x128xf32>
    %52 = vector.broadcast %51 : vector<1x128xf32> to vector<3x128xf32>
    %53 = arith.mulf %5, %52 : vector<3x128xf32>
    %54 = arith.addf %50, %53 : vector<3x128xf32>
    %c2_i32 = arith.constant 2 : i32
    %55 = vector.broadcast %c2_i32 : i32 to vector<3x1xi32>
    %56 = arith.cmpi eq, %6, %55 : vector<3x1xi32>
    %57 = arith.extui %56 : vector<3x1xi1> to vector<3x1xi32>
    %58 = arith.sitofp %57 : vector<3x1xi32> to vector<3x1xf32>
    %59 = vector.broadcast %58 : vector<3x1xf32> to vector<3x128xf32>
    %60 = arith.subf %54, %59 : vector<3x128xf32>
    %61 = arith.mulf %60, %60 : vector<3x128xf32>
    %62 = arith.addf %43, %61 : vector<3x128xf32>
    %c0_17 = arith.constant 0 : index
    %c0_18 = arith.constant 0 : index
    %63 = vector.load %arg6[%c0_17, %c0_18] : memref<3x128xf32, #tpu.memory_space<vmem>>, vector<3x128xf32>
    %64 = arith.addf %63, %62 : vector<3x128xf32>
    %c0_19 = arith.constant 0 : index
    %c0_20 = arith.constant 0 : index
    %65 = vector.load %arg6[%c0_19, %c0_20] : memref<3x128xf32, #tpu.memory_space<vmem>>, vector<3x128xf32>
    tpu.vector_store %arg6[%c0_19, %c0_20], %64 {strides = array<i32>} : memref<3x128xf32, #tpu.memory_space<vmem>>, vector<3x128xf32>,
    %c3 = arith.constant 3 : index
    %c0_21 = arith.constant 0 : index
    %66 = vector.load %arg2[%c3, %c0_21] : memref<16x128xf32, #tpu.memory_space<vmem>>, vector<1x128xf32>
    %c3_22 = arith.constant 3 : index
    %c0_23 = arith.constant 0 : index
    %67 = vector.load %arg3[%c3_22, %c0_23] : memref<16x128xf32, #tpu.memory_space<vmem>>, vector<1x128xf32>
    %68 = arith.subf %66, %67 : vector<1x128xf32>
    %c7 = arith.constant 7 : index
    %c0_24 = arith.constant 0 : index
    %69 = vector.load %arg2[%c7, %c0_24] : memref<16x128xf32, #tpu.memory_space<vmem>>, vector<1x128xf32>
    %c7_25 = arith.constant 7 : index
    %c0_26 = arith.constant 0 : index
    %70 = vector.load %arg3[%c7_25, %c0_26] : memref<16x128xf32, #tpu.memory_space<vmem>>, vector<1x128xf32>
    %71 = arith.subf %69, %70 : vector<1x128xf32>
    %c11 = arith.constant 11 : index
    %c0_27 = arith.constant 0 : index
    %72 = vector.load %arg2[%c11, %c0_27] : memref<16x128xf32, #tpu.memory_space<vmem>>, vector<1x128xf32>
    %c11_28 = arith.constant 11 : index
    %c0_29 = arith.constant 0 : index
    %73 = vector.load %arg3[%c11_28, %c0_29] : memref<16x128xf32, #tpu.memory_space<vmem>>, vector<1x128xf32>
    %74 = arith.subf %72, %73 : vector<1x128xf32>
    %c0_30 = arith.constant 0 : index
    %c0_31 = arith.constant 0 : index
    %75 = vector.load %arg7[%c0_30, %c0_31] : memref<1x128xf32, #tpu.memory_space<vmem>>, vector<1x128xf32>
    %76 = arith.mulf %68, %68 : vector<1x128xf32>
    %77 = arith.mulf %71, %71 : vector<1x128xf32>
    %78 = arith.addf %76, %77 : vector<1x128xf32>
    %79 = arith.mulf %74, %74 : vector<1x128xf32>
    %80 = arith.addf %78, %79 : vector<1x128xf32>
    %81 = arith.addf %75, %80 : vector<1x128xf32>
    %c0_32 = arith.constant 0 : index
    %c0_33 = arith.constant 0 : index
    %82 = vector.load %arg7[%c0_32, %c0_33] : memref<1x128xf32, #tpu.memory_space<vmem>>, vector<1x128xf32>
    tpu.vector_store %arg7[%c0_32, %c0_33], %81 {strides = array<i32>} : memref<1x128xf32, #tpu.memory_space<vmem>>, vector<1x128xf32>,
    %c0_i32_34 = arith.constant 0 : i32
    %83 = arith.cmpi eq, %arg1, %c0_i32_34 : i32
    %84 = arith.extui %83 : i1 to i32
    %c0_i32_35 = arith.constant 0 : i32
    %85 = arith.cmpi ne, %84, %c0_i32_35 : i32
    scf.if %85 {
      %c0_36 = arith.constant 0 : index
      %c0_37 = arith.constant 0 : index
      %86 = vector.load %arg6[%c0_36, %c0_37] : memref<3x128xf32, #tpu.memory_space<vmem>>, vector<3x128xf32>
      %87 = vector.shape_cast %86 : vector<3x128xf32> to vector<1x3x128xf32>
      %cst = arith.constant dense<0.000000e+00> : vector<1xf32>
      %88 = vector.multi_reduction <add>, %87, %cst [1, 2] : vector<1x3x128xf32> to vector<1xf32>
      %89 = vector.shape_cast %88 : vector<1xf32> to vector<1x1x1xf32>
      %90 = vector.extract %89[0, 0, 0] : f32 from vector<1x1x1xf32>
      %91 = vector.broadcast %90 : f32 to vector<1x1xf32>
      %c0_38 = arith.constant 0 : index
      %c0_39 = arith.constant 0 : index
      %92 = vector.load %arg7[%c0_38, %c0_39] : memref<1x128xf32, #tpu.memory_space<vmem>>, vector<1x128xf32>
      %93 = vector.shape_cast %92 : vector<1x128xf32> to vector<1x1x128xf32>
      %cst_40 = arith.constant dense<0.000000e+00> : vector<1xf32>
      %94 = vector.multi_reduction <add>, %93, %cst_40 [1, 2] : vector<1x1x128xf32> to vector<1xf32>
      %95 = vector.shape_cast %94 : vector<1xf32> to vector<1x1x1xf32>
      %96 = vector.extract %95[0, 0, 0] : f32 from vector<1x1x1xf32>
      %97 = vector.broadcast %96 : f32 to vector<1x1xf32>
      %98 = vector.shape_cast %91 : vector<1x1xf32> to vector<1x1xf32>
      %99 = vector.broadcast %98 : vector<1x1xf32> to vector<8x128xf32>
      %c0_41 = arith.constant 0 : index
      %c0_42 = arith.constant 0 : index
      %100 = vector.load %arg4[%c0_41, %c0_42] : memref<8x128xf32, #tpu.memory_space<vmem>>, vector<8x128xf32>
      tpu.vector_store %arg4[%c0_41, %c0_42], %99 {strides = array<i32>} : memref<8x128xf32, #tpu.memory_space<vmem>>, vector<8x128xf32>,
      %101 = vector.shape_cast %97 : vector<1x1xf32> to vector<1x1xf32>
      %102 = vector.broadcast %101 : vector<1x1xf32> to vector<8x128xf32>
      %c0_43 = arith.constant 0 : index
      %c0_44 = arith.constant 0 : index
      %103 = vector.load %arg5[%c0_43, %c0_44] : memref<8x128xf32, #tpu.memory_space<vmem>>, vector<8x128xf32>
      tpu.vector_store %arg5[%c0_43, %c0_44], %102 {strides = array<i32>} : memref<8x128xf32, #tpu.memory_space<vmem>>, vector<8x128xf32>,
    } else {
    }
    return
  }
  func.func @transform_0(%arg0: i32, %arg1: i32) -> (i32, i32) {
    %c1_i32 = arith.constant 1 : i32
    %0 = arith.muli %arg0, %c1_i32 : i32
    %1 = arith.addi %0, %arg1 : i32
    %c0_i32 = arith.constant 0 : i32
    %c0_i32_0 = arith.constant 0 : i32
    return %c0_i32, %1 : i32, i32
  }
  func.func @transform_1(%arg0: i32, %arg1: i32) -> (i32, i32) {
    %c1_i32 = arith.constant 1 : i32
    %0 = arith.muli %arg0, %c1_i32 : i32
    %1 = arith.addi %0, %arg1 : i32
    %c0_i32 = arith.constant 0 : i32
    %c0_i32_0 = arith.constant 0 : i32
    return %c0_i32, %1 : i32, i32
  }
  func.func @transform_2(%arg0: i32, %arg1: i32) -> (i32, i32) {
    %c0_i32 = arith.constant 0 : i32
    %c0_i32_0 = arith.constant 0 : i32
    return %arg0, %c0_i32 : i32, i32
  }
  func.func @transform_3(%arg0: i32, %arg1: i32) -> (i32, i32) {
    %c0_i32 = arith.constant 0 : i32
    %c0_i32_0 = arith.constant 0 : i32
    return %arg0, %c0_i32 : i32, i32
  }
}

</mosaic_0001>

<bundles_post_ra>
// kernel: tpu_custom_call.1
= control target key start
LH: loop header
LB: loop body
LE: loop exit
PB: predicated region body
PF: predicated region fallthrough
CT: control target
= control target key end

     0   :  { %9 = vsyncpa [#allocation5], 0  ;;  %s370_s0 = inlined_call_operand.hbm [shape: f32[16,128], index: 0, kind: input, shape index: {}]   ;;  %s371_s1 = inlined_call_operand.hbm [shape: f32[16,128], index: 1, kind: input, shape index: {}]   ;;  %s372_s2 = inlined_call_operand.hbm [shape: f32[8,128], index: 2, kind: output, shape index: {0}]   ;;  %s373_s3 = inlined_call_operand.hbm [shape: f32[8,128], index: 3, kind: output, shape index: {1}]  }
   0x1   :  { %10 = vsyncpa [#allocation8], 0 }
   0x2   :  { %11 = vsyncpa [#allocation6], 0 }
   0x3   :  { %12 = vsyncpa [#allocation11], 0  ;;  %s20_s14 = sshll.u32 %s370_s0, 4  ;;  %s328_s15 = smov [#allocation4]   ;;  %s21_s14 = int_to_ptr.hbm [resolvable:$true] %s20_s14 }
   0x4   :  { %s22_s16 = sshll.u32 %s328_s15, 4  ;;  %s36_s19 = sshll.u32 %s371_s1, 4  ;;  %s23_s16 = int_to_ptr.vmem [resolvable:$true] %s22_s16  ;;  %s37_s19 = int_to_ptr.hbm [resolvable:$true] %s36_s19 }
   0x5   :  { %s329_s20 = smov 128   ;;  %s330_s21 = smov 8  }
   0x6   :  { %28 = dma.hbm_to_vmem [thread:$0]  %s21_s14, 256, %s23_s16, [#allocation5], %s329_s20, %s329_s20, %s330_s21  }
   0x7   :  { %s331_s22 = smov [#allocation7]  }
   0x8   :  { %s38_s23 = sshll.u32 %s331_s22, 4  ;;  %s39_s23 = int_to_ptr.vmem [resolvable:$true] %s38_s23 }
   0x9   :  { %44 = dma.hbm_to_vmem [thread:$0]  %s37_s19, 256, %s39_s23, [#allocation8], %s329_s20, %s329_s20, %s330_s21  }
   0xa   :  { %320 = dma.done.wait [#allocation5], 256  }
   0xb   :  { %321 = vsyncadd [#allocation5], 4294967040 }
   0xc   :  { %322 = dma.done.wait [#allocation8], 256  }
   0xd   :  { %323 = vsyncadd [#allocation8], 4294967040  ;;  %v64_v0 = vlaneseq  ;;  %v332_v1 = vmov 0.0   ;;  %v61_v3 = vld [vmem:[#allocation4] sm:$0x7]  ;;  %vm140_vm3 = vcmask 1042432  }
   0xe   :  { %59 = vst [vmem:[#allocation2] sm:$0x7] %v332_v1  ;;  %v62_v4 = vld [vmem:[#allocation4 + $0x4] sm:$0x7]  ;;  %v63_v5 = vld [vmem:[#allocation4 + $0x8] sm:$0x7] }
   0xf   :  { %v65_v2 = vshrl.u32 %v64_v0, 7  ;;  %60 = vst [vmem:[#allocation3] sm:$0x1] %v332_v1  ;;  %v215_v6 = vld [vmem:[#allocation7] ss:$0 sm:$0xff]  ;;  %vm152_vm4 = vcmask 1040384  }
  0x10   :  { %v216_v7 = vld [vmem:[#allocation7 + $0x4] ss:$0 sm:$0xff]  ;;  %v217_v8 = vld [vmem:[#allocation7 + $0x8] ss:$0 sm:$0xff]  ;;  %v68_v9 = vmul.f32 %v215_v6, %v61_v3  ;;  %v218_v10 = vld [vmem:[#allocation7 + $0x1] ss:$0 sm:$0xff] }
  0x11   :  { %vm77_vm0 = vcmp.eq.s32.totalorder %v65_v2, 0  ;;  %vm93_vm1 = vcmp.eq.s32.totalorder %v65_v2, 1  ;;  %v71_v11 = vmul.f32 %v216_v7, %v62_v4  ;;  %v75_v12 = vmul.f32 %v217_v8, %v63_v5  ;;  %v219_v13 = vld [vmem:[#allocation7 + $0x5] ss:$0 sm:$0xff]  ;;  %v220_v14 = vld [vmem:[#allocation7 + $0x9] ss:$0 sm:$0xff] }
  0x12   :  { %v84_v15 = vmul.f32 %v218_v10, %v61_v3  ;;  %v221_v16 = vld [vmem:[#allocation7 + $0x2] ss:$0 sm:$0xff]  ;;  %v87_v18 = vmul.f32 %v219_v13, %v62_v4  ;;  %v91_v19 = vmul.f32 %v220_v14, %v63_v5  ;;  %v222_v20 = vld [vmem:[#allocation7 + $0x6] ss:$0 sm:$0xff]  ;;  %v223_v21 = vld [vmem:[#allocation7 + $0xa] ss:$0 sm:$0xff] }
  0x13   :  { %v72_v17 = vadd.f32 %v71_v11, %v68_v9  ;;  %v201_v22 = vsel %vm77_vm0, 1.0, %v332_v1  ;;  %v101_v23 = vmul.f32 %v221_v16, %v61_v3  ;;  %vm110_vm2 = vcmp.eq.s32.totalorder %v65_v2, 2  ;;  %v119_v24 = vld [vmem:[#allocation4 + $0x3] sm:$0x1]  ;;  %v120_v25 = vld [vmem:[#allocation7 + $0x3] sm:$0x1] }
  0x14   :  { %v88_v27 = vadd.f32 %v87_v18, %v84_v15  ;;  %v104_v28 = vmul.f32 %v222_v20, %v62_v4  ;;  %v108_v29 = vmul.f32 %v223_v21, %v63_v5  ;;  %v122_v30 = vld [vmem:[#allocation4 + $0x7] sm:$0x1]  ;;  %v123_v31 = vld [vmem:[#allocation7 + $0x7] sm:$0x1]  ;;  %v125_v32 = vld [vmem:[#allocation4 + $0xb] sm:$0x1]  ;;  %v121_v34 = vsub.f32 %v119_v24, %v120_v25 }
  0x15   :  { %v76_v26 = vadd.f32 %v75_v12, %v72_v17  ;;  %v202_v33 = vsel %vm93_vm1, 1.0, %v332_v1  ;;  %v124_v35 = vsub.f32 %v122_v30, %v123_v31  ;;  %v126_v36 = vld [vmem:[#allocation7 + $0xb] sm:$0x1]  ;;  %v203_v41 = vsel %vm110_vm2, 1.0, %v332_v1  ;;  %s333_s0 = smov [#allocation9]   ;;  %s174_s26 = sshll.u32 %s372_s2, 4  ;;  %s175_s26 = int_to_ptr.hbm [resolvable:$true] %s174_s26 }
  0x16   :  { %v92_v38 = vadd.f32 %v91_v19, %v88_v27  ;;  %v105_v39 = vadd.f32 %v104_v28, %v101_v23  ;;  %v127_v40 = vsub.f32 %v125_v32, %v126_v36  ;;  %v129_v42 = vmul.f32 %v121_v34, %v121_v34  ;;  %v128_v51 = vld [vmem:[#allocation3] sm:$0x1]  ;;  %v116_v55 = vld [vmem:[#allocation2] sm:$0x7]  ;;  %s172_s1 = sshll.u32 %s333_s0, 4  ;;  %s334_s28 = smov [#allocation10]   ;;  %s173_s1 = int_to_ptr.vmem [resolvable:$true] %s172_s1 }
  0x17   :  { %v80_v37 = vsub.f32 %v76_v26, %v201_v22  ;;  %v130_v43 = vmul.f32 %v124_v35, %v124_v35  ;;  %s183_s29 = sshll.u32 %s334_s28, 4  ;;  %s185_s5 = sshll.u32 %s373_s3, 4  ;;  %s184_s29 = int_to_ptr.vmem [resolvable:$true] %s183_s29  ;;  %s186_s5 = int_to_ptr.hbm [resolvable:$true] %s185_s5 }
  0x18   :  { %v96_v45 = vsub.f32 %v92_v38, %v202_v33  ;;  %v109_v46 = vadd.f32 %v108_v29, %v105_v39  ;;  %v132_v47 = vmul.f32 %v127_v40, %v127_v40 }
  0x19   :  { %v81_v44 = vmul.f32 %v80_v37, %v80_v37  ;;  %v131_v48 = vadd.f32 %v130_v43, %v129_v42 }
  0x1a   :  { %v97_v49 = vmul.f32 %v96_v45, %v96_v45  ;;  %v113_v50 = vsub.f32 %v109_v46, %v203_v41 }
  0x1b   :  { %v133_v52 = vadd.f32 %v132_v47, %v131_v48 }
  0x1c   :  { %v98_v53 = vadd.f32 %v97_v49, %v81_v44  ;;  %v114_v54 = vmul.f32 %v113_v50, %v113_v50 }
  0x1d   :  { %v134_v56 = vadd.f32 %v133_v52, %v128_v51 }
  0x1e   :  { %v115_v57 = vadd.f32 %v114_v54, %v98_v53 }
  0x1f   :  { %135 = vst [vmem:[#allocation3] sm:$0x1] %v134_v56 }
  0x20   :  { %v117_v58 = vadd.f32 %v116_v55, %v115_v57 }
  0x22   :  { %118 = vst [vmem:[#allocation2] sm:$0x7] %v117_v58 }
  0x26   :  { %v151_v61 = vld [vmem:[#allocation3] sm:$0x1] }
  0x27   :  { %v153_v62 = vsel %vm152_vm4, %v151_v61, 0.0 }
  0x29   :  { %v139_v59 = vld [vmem:[#allocation2] sm:$0x7] }
  0x2a   :  { %v141_v60 = vsel %vm140_vm3, %v139_v59, 0.0 }
  0x2b   :  { %142 = vadd.xlane.f32.xlu0 %v141_v60 }
  0x33   :  { %154 = vadd.xlane.f32.xlu0 %v153_v62 }
  0x9e   :  { %v143_v63 = vpop.xlane.xlu0 %142 }
  0x9f   :  { %v144_v0 = vrot.slane %v143_v63, 4 }
  0xa1   :  { %v145_v1 = vadd.f32 %v144_v0, %v143_v63 }
  0xa3   :  { %v146_v2 = vrot.slane %v145_v1, 2 }
  0xa5   :  { %v147_v3 = vadd.f32 %v146_v2, %v145_v1 }
  0xa6   :  { %v155_v4 = vpop.xlane.xlu0 %154 }
  0xa7   :  { %v156_v5 = vrot.slane %v155_v4, 4  ;;  %v148_v6 = vrot.slane %v147_v3, 1 }
  0xa9   :  { %v157_v7 = vadd.f32 %v156_v5, %v155_v4  ;;  %v149_v8 = vadd.f32 %v148_v6, %v147_v3 }
  0xab   :  { %v158_v9 = vrot.slane %v157_v7, 2  ;;  %204 = vpush %v149_v8 }
  0xad   :  { %v159_v10 = vadd.f32 %v158_v9, %v157_v7 }
  0xaf   :  { %v160_v11 = vrot.slane %v159_v10, 1 }
  0xb1   :  { %v161_v12 = vadd.f32 %v160_v11, %v159_v10 }
  0xb3   :  { %206 = vpush %v161_v12 }
  0xdc   :  { %s205_s27 = spop %204 }
  0xdd   :  { %v163_v13 = vstv %s205_s27 }
  0xde   :  { %164 = vst [vmem:[#allocation9] sm:$0xff] %v163_v13 }
  0xdf   :  { %177 = dma.vmem_to_hbm [thread:$0]  %s173_s1, 128, %s175_s26, [#allocation6]  }
  0xe4   :  { %s207_s6 = spop %206 }
  0xe5   :  { %v165_v14 = vstv %s207_s6 }
  0xe6   :  { %166 = vst [vmem:[#allocation10] sm:$0xff] %v165_v14 }
  0xe7   :  { %188 = dma.vmem_to_hbm [thread:$0]  %s184_s29, 128, %s186_s5, [#allocation11]  }
  0xe8   :  { %324 = dma.done.wait [#allocation6], 128  }
  0xe9   :  { %325 = vsyncadd [#allocation6], 4294967168 }
  0xea   :  { %326 = dma.done.wait [#allocation11], 128  }
  0xeb   :  { %327 = vsyncadd [#allocation11], 4294967168 }
  0xec   :  { %197 = vsyncpa [#allocation5], 1 }
  0xed   :  { %198 = vsyncpa [#allocation8], 1 }
  0xee   :  { %199 = vsyncpa [#allocation6], 1 }
  0xef   :  { %200 = vsyncpa [#allocation11], 1 }

</bundles_post_ra>
